<compile_context>
chip_gen: v7x
topology: tpu7x:2x2x1
jax: 0.10.0
libtpu: 0.0.40
codegen_flags: <defaults>
</compile_context>

<pallas_src>
import jax
import jax.numpy as jnp
from jax.experimental import pallas as pl
from jax.experimental.pallas import tpu as pltpu

# Older jax releases expose TPUCompilerParams; newer ones CompilerParams.
_CompilerParams = getattr(pltpu, "CompilerParams", None) or getattr(
    pltpu, "TPUCompilerParams"
)


def _round_up(x, m):
    return ((x + m - 1) // m) * m


def _dft_cos_sin(n, dtype):
    # Integer-exact angle reduction: (k*n) % N before converting to float, so
    # large N does not lose mantissa in k*n (valid with int32 for n < ~46341).
    k = jnp.arange(n, dtype=jnp.int32)
    kn = (k[:, None] * k[None, :]) % n
    ang = kn.astype(jnp.float32) * (2.0 * jnp.pi / float(n))
    return jnp.cos(ang).astype(dtype), jnp.sin(ang).astype(dtype)


# ----------------------------------------------------------------------------
# Path A: small H*W — single Kronecker matmul, lane-dense, batched rows.
# ----------------------------------------------------------------------------
def _kron_kernel(x_ref, m_ref, o_ref):
    # x_ref: (B, H*W) bf16, m_ref: (H*W, H*W) bf16, o_ref: (B, H*W) f32.
    o_ref[...] = jnp.dot(
        x_ref[...], m_ref[...], preferred_element_type=jnp.float32
    ).astype(o_ref.dtype)


def _fourier_kron(xf, compute_dtype):
    nc, h, w = xf.shape
    hw = h * w

    ch, sh = _dft_cos_sin(h, jnp.float32)
    cw, sw = _dft_cos_sin(w, jnp.float32)
    # y_flat = x_flat @ M with
    # M[h'*W+w', k*W+l] = Ch[k,h']Cw[l,w'] - Sh[k,h']Sw[l,w']  (M is symmetric).
    m = (jnp.kron(ch, cw) - jnp.kron(sh, sw)).astype(compute_dtype)

    # Batch many slices per grid step; ~1 MiB of bf16 rows per block, cap 512.
    blk = (1024 * 1024) // (2 * hw)
    blk = max(16, min(512, (blk // 16) * 16))
    blk = min(blk, _round_up(nc, 16))
    nc_pad = _round_up(nc, blk)

    x2 = xf.reshape(nc, hw).astype(compute_dtype)
    if nc_pad != nc:
        x2 = jnp.pad(x2, ((0, nc_pad - nc), (0, 0)))

    out = pl.pallas_call(
        _kron_kernel,
        out_shape=jax.ShapeDtypeStruct((nc_pad, hw), jnp.float32),
        grid=(nc_pad // blk,),
        in_specs=[
            pl.BlockSpec((blk, hw), lambda i: (i, 0)),
            # Grid-invariant DFT matrix: constant index_map -> fetched once.
            pl.BlockSpec((hw, hw), lambda i: (0, 0)),
        ],
        out_specs=pl.BlockSpec((blk, hw), lambda i: (i, 0)),
        compiler_params=_CompilerParams(
            dimension_semantics=("parallel",),
            vmem_limit_bytes=32 * 1024 * 1024,
        ),
    )(x2, m)
    return out[:nc].reshape(nc, h, w)


# ----------------------------------------------------------------------------
# Path B: larger H, W — separable form, 4 plain 2-D MXU matmuls per plane.
# ----------------------------------------------------------------------------
def _separable_kernel(x_ref, cw_ref, sw_ref, ch_ref, sh_ref, o_ref):
    b = x_ref.shape[0]
    cdt = cw_ref.dtype
    cw = cw_ref[...]
    sw = sw_ref[...]
    ch = ch_ref[...]
    sh = sh_ref[...]
    # Static unroll over the (small, <= 8) per-step batch of planes.
    for i in range(b):
        p = x_ref[i]                                                    # (H, W)
        # W stage: contract the lane axis.
        pc = jnp.dot(p, cw, preferred_element_type=jnp.float32).astype(cdt)
        ps = jnp.dot(p, sw, preferred_element_type=jnp.float32).astype(cdt)
        # H stage: Ch @ (X Cw) - Sh @ (X Sw); lhs contraction on lane, rhs on
        # sublane -> MXU-natural, no transposes required.
        y = (jnp.dot(ch, pc, preferred_element_type=jnp.float32)
             - jnp.dot(sh, ps, preferred_element_type=jnp.float32))
        o_ref[i] = y.astype(o_ref.dtype)


def _fourier_separable(xf, compute_dtype):
    nc, h, w = xf.shape
    ch, sh = _dft_cos_sin(h, compute_dtype)
    cw, sw = _dft_cos_sin(w, compute_dtype)

    # Planes per grid step: ~2 MiB of f32 output per block, unroll capped at 8.
    blk = max(1, min(8, (2 * 1024 * 1024) // (4 * h * w)))
    blk = min(blk, nc)
    nc_pad = _round_up(nc, blk)
    x3 = xf.astype(compute_dtype)
    if nc_pad != nc:
        x3 = jnp.pad(x3, ((0, nc_pad - nc), (0, 0), (0, 0)))

    # TODO(synk): for very large H,W (>= ~1024) K-tile / single-buffer the DFT
    # matrices so the working set fits v7x's 64 MiB VMEM.
    out = pl.pallas_call(
        _separable_kernel,
        out_shape=jax.ShapeDtypeStruct((nc_pad, h, w), jnp.float32),
        grid=(nc_pad // blk,),
        in_specs=[
            pl.BlockSpec((blk, h, w), lambda i: (i, 0, 0)),
            # Grid-invariant DFT matrices: constant index_maps.
            pl.BlockSpec((w, w), lambda i: (0, 0)),
            pl.BlockSpec((w, w), lambda i: (0, 0)),
            pl.BlockSpec((h, h), lambda i: (0, 0)),
            pl.BlockSpec((h, h), lambda i: (0, 0)),
        ],
        out_specs=pl.BlockSpec((blk, h, w), lambda i: (i, 0, 0)),
        compiler_params=_CompilerParams(
            dimension_semantics=("parallel",),
            vmem_limit_bytes=32 * 1024 * 1024,
        ),
    )(x3, cw, sw, ch, sh)
    return out[:nc]


def fourier_block(x, *, compute_dtype=jnp.bfloat16, kron_max_hw=2048):
    """Real(fft(fft(x, dim=-1), dim=-2)) for real x of shape (N, C, H, W)."""
    n, c, h, w = x.shape
    xf = x.reshape(n * c, h, w)
    if h * w <= kron_max_hw:
        y = _fourier_kron(xf, compute_dtype)
    else:
        y = _fourier_separable(xf, compute_dtype)
    return y.reshape(n, c, h, w)


if __name__ == "__main__":
    key = jax.random.PRNGKey(0)
    k1, k2 = jax.random.split(key)

    def _ref(a):
        return jnp.real(
            jnp.fft.fft(jnp.fft.fft(a, axis=-1), axis=-2)
        ).astype(jnp.float32)

    # Small shape from the module spec (exercises the Kronecker fast path).
    x = jax.random.normal(k1, (2, 4, 16, 16), dtype=jnp.float32)
    y = jax.block_until_ready(fourier_block(x))
    assert y.shape == x.shape and y.dtype == jnp.float32
    r = _ref(x)
    rel = float(jnp.linalg.norm(y - r) / jnp.linalg.norm(r))
    assert rel < 4e-2, rel  # bf16 operands, f32 accumulation

    # Also exercise the separable path used for larger H, W.
    x2 = jax.random.normal(k2, (1, 2, 128, 128), dtype=jnp.float32)
    y2 = jax.block_until_ready(fourier_block(x2))
    r2 = _ref(x2)
    rel2 = float(jnp.linalg.norm(y2 - r2) / jnp.linalg.norm(r2))
    assert rel2 < 4e-2, rel2

    print("KERNEL_OK")
</pallas_src>

<mosaic_0001>
module attributes {stable_mosaic.version = 11 : i64} {
  func.func @_kron_kernel(%arg0: i32, %arg1: memref<16x256xbf16, #tpu.memory_space<vmem>>, %arg2: memref<256x256xbf16, #tpu.memory_space<vmem>>, %arg3: memref<16x256xf32, #tpu.memory_space<vmem>>) attributes {dimension_semantics = [#tpu.dimension_semantics<parallel>], iteration_bounds = array<i64: 1>, scalar_prefetch = 0 : i64, scratch_operands = 0 : i64, tpu.core_type = #tpu.core_type<tc>, window_params = [{transform_indices = @transform_0, window_bounds = array<i64: 16, 256>}, {pipeline_mode = #tpu.pipeline_mode<synchronous>, transform_indices = @transform_1, window_bounds = array<i64: 256, 256>}, {transform_indices = @transform_2, window_bounds = array<i64: 16, 256>}]} {
    %c0 = arith.constant 0 : index
    %c0_0 = arith.constant 0 : index
    %0 = vector.load %arg1[%c0, %c0_0] : memref<16x256xbf16, #tpu.memory_space<vmem>>, vector<16x256xbf16>
    %c0_1 = arith.constant 0 : index
    %c0_2 = arith.constant 0 : index
    %1 = vector.load %arg2[%c0_1, %c0_2] : memref<256x256xbf16, #tpu.memory_space<vmem>>, vector<256x256xbf16>
    %cst = arith.constant dense<0.000000e+00> : vector<16x256xf32>
    %2 = tpu.matmul %0, %1, %cst {dimension_numbers = #tpu.dot_dimension_numbers<[1], [0], [0], [1], [0, 0, 1, 1], [], []>} : vector<16x256xbf16>, vector<256x256xbf16>, vector<16x256xf32> -> vector<16x256xf32>
    %c0_3 = arith.constant 0 : index
    %c0_4 = arith.constant 0 : index
    %3 = vector.load %arg3[%c0_3, %c0_4] : memref<16x256xf32, #tpu.memory_space<vmem>>, vector<16x256xf32>
    tpu.vector_store %arg3[%c0_3, %c0_4], %2 {strides = array<i32>} : memref<16x256xf32, #tpu.memory_space<vmem>>, vector<16x256xf32>,
    return
  }
  func.func @transform_0(%arg0: i32) -> (i32, i32) {
    %c0_i32 = arith.constant 0 : i32
    %c0_i32_0 = arith.constant 0 : i32
    return %arg0, %c0_i32 : i32, i32
  }
  func.func @transform_1(%arg0: i32) -> (i32, i32) {
    %c0_i32 = arith.constant 0 : i32
    %c0_i32_0 = arith.constant 0 : i32
    %c0_i32_1 = arith.constant 0 : i32
    return %c0_i32, %c0_i32_0 : i32, i32
  }
  func.func @transform_2(%arg0: i32) -> (i32, i32) {
    %c0_i32 = arith.constant 0 : i32
    %c0_i32_0 = arith.constant 0 : i32
    return %arg0, %c0_i32 : i32, i32
  }
}

</mosaic_0001>

<bundles_post_ra>
// kernel: tpu_custom_call.1
= control target key start
LH: loop header
LB: loop body
LE: loop exit
PB: predicated region body
PF: predicated region fallthrough
CT: control target
= control target key end

     0   :  { %7 = vsyncpa [#allocation3], 0  ;;  %s531_s0 = inlined_call_operand.hbm [shape: bf16[16,256], index: 0, kind: input, shape index: {}]   ;;  %s532_s1 = inlined_call_operand.hbm [shape: bf16[256,256], index: 1, kind: input, shape index: {}]   ;;  %s533_s2 = inlined_call_operand.hbm [shape: f32[16,256], index: 2, kind: output, shape index: {}]  }
   0x1   :  { %8 = vsyncpa [#allocation6], 0 }
   0x2   :  { %9 = vsyncpa [#allocation4], 0  ;;  %s473_s9 = smov [#allocation2]   ;;  %s401_s13 = scalar_lea.hbm %s531_s0, 256 }
   0x3   :  { %s15_s10 = sshll.u32 %s473_s9, 4  ;;  %p402_p0 = scmp.ne.s32.totalorder %s531_s0, %s401_s13  ;;  %s16_s10 = int_to_ptr.vmem [resolvable:$true] %s15_s10 }
   0x4   :  { %p405_p1 = scmp.lt.u32.totalorder %s401_s13, %s531_s0 }
   0x6   :  { %p407_p2 = pnand %p405_p1, %p402_p0 }
   0x8   :  { %410 = shalt.err (!%p407_p2)
}
   0x9   :  { %s411_s18 = scalar_lea.vmem %s16_s10, 256  ;;  %p416_p4 = scmp.lt.s32.totalorder %s16_s10, %s16_s10 }
   0xa   :  { %p412_p3 = scmp.ne.s32.totalorder %s16_s10, %s411_s18  ;;  %p417_p5 = scmp.lt.s32.totalorder %s411_s18, %s411_s18 }
   0xc   :  { %p418_p6 = por %p417_p5, %p416_p4 }
   0xe   :  { %p419_p7 = pnand %p418_p6, %p412_p3 }
  0x10   :  { %422 = shalt.err (!%p419_p7)
}
  0x11   :  { %s474_s19 = smov 128   ;;  %s475_s20 = smov 8  }
  0x12   :  { %21 = dma.hbm_to_vmem [thread:$0]  %s531_s0, 256, %s16_s10, [#allocation3], %s474_s19, %s474_s19, %s475_s20  }
  0x13   :  { %s476_s23 = smov [#allocation5]   ;;  %s423_s27 = scalar_lea.hbm %s532_s1, 4096 }
  0x14   :  { %s27_s24 = sshll.u32 %s476_s23, 4  ;;  %p424_p8 = scmp.ne.s32.totalorder %s532_s1, %s423_s27  ;;  %s28_s24 = int_to_ptr.vmem [resolvable:$true] %s27_s24 }
  0x15   :  { %p427_p9 = scmp.lt.u32.totalorder %s423_s27, %s532_s1 }
  0x17   :  { %p429_p10 = pnand %p427_p9, %p424_p8 }
  0x19   :  { %432 = shalt.err (!%p429_p10)
}
  0x1a   :  { %s433_s4 = scalar_lea.vmem %s28_s24, 4096  ;;  %p438_p12 = scmp.lt.s32.totalorder %s28_s24, %s28_s24 }
  0x1b   :  { %p434_p11 = scmp.ne.s32.totalorder %s28_s24, %s433_s4  ;;  %p439_p13 = scmp.lt.s32.totalorder %s433_s4, %s433_s4 }
  0x1d   :  { %p440_p0 = por %p439_p13, %p438_p12 }
  0x1f   :  { %p441_p1 = pnand %p440_p0, %p434_p11 }
  0x21   :  { %444 = shalt.err (!%p441_p1)
}
  0x22   :  { %33 = dma.hbm_to_vmem [thread:$0]  %s532_s1, 4096, %s28_s24, [#allocation6], %s474_s19, %s474_s19, %s475_s20  }
  0x23   :  { %467 = dma.done.wait [#allocation3], 256  }
  0x24   :  { %468 = vsyncadd [#allocation3], 4294967040 }
  0x25   :  { %469 = dma.done.wait [#allocation6], 4096  }
  0x26   :  { %470 = vsyncadd [#allocation6], 4294963200  ;;  %v350_v0 = vld [vmem:[#allocation5 + $0x4] ss:$8 sps:$4 sm:$0xff]   ;;  %v352_v1 = vld [vmem:[#allocation5] ss:$8 sps:$4 sm:$0xff]  }
  0x27   :  { %244 = vmatprep.subr.bf16.mxu0 %v350_v0  ;;  %v353_v2 = vld [vmem:[#allocation5 + $0x14] ss:$8 sps:$4 sm:$0xff]   ;;  %v355_v3 = vld [vmem:[#allocation5 + $0x10] ss:$8 sps:$4 sm:$0xff]   ;;  %v356_v4 = vld [vmem:[#allocation5 + $0x24] ss:$8 sps:$4 sm:$0xff]  }
  0x28   :  { %245 = vmatpush1.bf16.msra.mxu0 %v352_v1  ;;  %v358_v5 = vld [vmem:[#allocation5 + $0x20] ss:$8 sps:$4 sm:$0xff]   ;;  %v359_v6 = vld [vmem:[#allocation5 + $0x34] ss:$8 sps:$4 sm:$0xff]   ;;  %v361_v7 = vld [vmem:[#allocation5 + $0x30] ss:$8 sps:$4 sm:$0xff]  }
  0x29   :  { %246 = vmatprep.subr.bf16.mxu0 %v353_v2  ;;  %v362_v8 = vld [vmem:[#allocation5 + $0x44] ss:$8 sps:$4 sm:$0xff]   ;;  %v364_v9 = vld [vmem:[#allocation5 + $0x40] ss:$8 sps:$4 sm:$0xff]   ;;  %v365_v10 = vld [vmem:[#allocation5 + $0x54] ss:$8 sps:$4 sm:$0xff]  }
  0x2a   :  { %v367_v11 = vld [vmem:[#allocation5 + $0x50] ss:$8 sps:$4 sm:$0xff]   ;;  %v368_v12 = vld [vmem:[#allocation5 + $0x64] ss:$8 sps:$4 sm:$0xff]   ;;  %v400_v13 = vld [vmem:[#allocation2 + $0x4] ss:$8 sps:$4 sm:$0xff]  }
  0x2b   :  { %v370_v14 = vld [vmem:[#allocation5 + $0x60] ss:$8 sps:$4 sm:$0xff]   ;;  %v371_v15 = vld [vmem:[#allocation5 + $0x74] ss:$8 sps:$4 sm:$0xff]   ;;  %276 = vmatprep.mubr.bf16.mxu0 %v400_v13  ;;  %v373_v16 = vld [vmem:[#allocation5 + $0x70] ss:$8 sps:$4 sm:$0xff]  }
  0x2c   :  { %247 = vmatpush1.bf16.msra.mxu0 %v355_v3  ;;  %v374_v17 = vld [vmem:[#allocation5 + $0x84] ss:$8 sps:$4 sm:$0xff]   ;;  %v376_v18 = vld [vmem:[#allocation5 + $0x80] ss:$8 sps:$4 sm:$0xff]   ;;  %v377_v19 = vld [vmem:[#allocation5 + $0x94] ss:$8 sps:$4 sm:$0xff]  }
  0x2d   :  { %248 = vmatprep.subr.bf16.mxu0 %v356_v4  ;;  %v379_v20 = vld [vmem:[#allocation5 + $0x90] ss:$8 sps:$4 sm:$0xff]   ;;  %v380_v21 = vld [vmem:[#allocation5 + $0xa4] ss:$8 sps:$4 sm:$0xff]   ;;  %v382_v22 = vld [vmem:[#allocation5 + $0xa0] ss:$8 sps:$4 sm:$0xff]  }
  0x2e   :  { %v383_v23 = vld [vmem:[#allocation5 + $0xb4] ss:$8 sps:$4 sm:$0xff]   ;;  %v385_v24 = vld [vmem:[#allocation5 + $0xb0] ss:$8 sps:$4 sm:$0xff]   ;;  %v386_v25 = vld [vmem:[#allocation5 + $0xc4] ss:$8 sps:$4 sm:$0xff]  }
  0x2f   :  { %v388_v26 = vld [vmem:[#allocation5 + $0xc0] ss:$8 sps:$4 sm:$0xff]   ;;  %v389_v27 = vld [vmem:[#allocation5 + $0xd4] ss:$8 sps:$4 sm:$0xff]   ;;  %v391_v28 = vld [vmem:[#allocation5 + $0xd0] ss:$8 sps:$4 sm:$0xff]  }
  0x30   :  { %249 = vmatpush1.bf16.msra.mxu0 %v358_v5  ;;  %v392_v29 = vld [vmem:[#allocation5 + $0xe4] ss:$8 sps:$4 sm:$0xff]   ;;  %v394_v30 = vld [vmem:[#allocation5 + $0xe0] ss:$8 sps:$4 sm:$0xff]   ;;  %v395_v31 = vld [vmem:[#allocation5 + $0xf4] ss:$8 sps:$4 sm:$0xff]  }
  0x31   :  { %250 = vmatprep.subr.bf16.mxu0 %v359_v6  ;;  %v397_v32 = vld [vmem:[#allocation5 + $0xf0] ss:$8 sps:$4 sm:$0xff]   ;;  %s477_s1 = smov [#allocation7]  }
  0x32   :  { %v398_v33 = vld [vmem:[#allocation2] ss:$8 sps:$4 sm:$0xff]   ;;  %s296_s6 = sshll.u32 %s477_s1, 4  ;;  %s297_s6 = int_to_ptr.vmem [resolvable:$true] %s296_s6 }
  0x33   :  { %s445_s7 = scalar_lea.vmem %s297_s6, 512  ;;  %p450_p3 = scmp.lt.s32.totalorder %s297_s6, %s297_s6 }
  0x34   :  { %251 = vmatpush1.bf16.msra.mxu0 %v361_v7  ;;  %p446_p2 = scmp.ne.s32.totalorder %s297_s6, %s445_s7  ;;  %p451_p4 = scmp.lt.s32.totalorder %s445_s7, %s445_s7 }
  0x35   :  { %252 = vmatprep.subr.bf16.mxu0 %v362_v8 }
  0x36   :  { %p452_p5 = por %p451_p4, %p450_p3 }
  0x38   :  { %253 = vmatpush1.bf16.msra.mxu0 %v364_v9  ;;  %p453_p6 = pnand %p452_p5, %p446_p2 }
  0x39   :  { %254 = vmatprep.subr.bf16.mxu0 %v365_v10 }
  0x3c   :  { %255 = vmatpush1.bf16.msra.mxu0 %v367_v11 }
  0x3d   :  { %256 = vmatprep.subr.bf16.mxu0 %v368_v12 }
  0x40   :  { %257 = vmatpush1.bf16.msra.mxu0 %v370_v14 }
  0x41   :  { %258 = vmatprep.subr.bf16.mxu0 %v371_v15 }
  0x44   :  { %259 = vmatpush1.bf16.msra.mxu0 %v373_v16 }
  0x45   :  { %260 = vmatprep.subr.bf16.mxu0 %v374_v17 }
  0x48   :  { %261 = vmatpush1.bf16.msra.mxu0 %v376_v18 }
  0x49   :  { %262 = vmatprep.subr.bf16.mxu0 %v377_v19 }
  0x4c   :  { %263 = vmatpush1.bf16.msra.mxu0 %v379_v20 }
  0x4d   :  { %264 = vmatprep.subr.bf16.mxu0 %v380_v21 }
  0x50   :  { %265 = vmatpush1.bf16.msra.mxu0 %v382_v22 }
  0x51   :  { %266 = vmatprep.subr.bf16.mxu0 %v383_v23 }
  0x54   :  { %267 = vmatpush1.bf16.msra.mxu0 %v385_v24 }
  0x55   :  { %268 = vmatprep.subr.bf16.mxu0 %v386_v25 }
  0x58   :  { %269 = vmatpush1.bf16.msra.mxu0 %v388_v26 }
  0x59   :  { %270 = vmatprep.subr.bf16.mxu0 %v389_v27 }
  0x5c   :  { %271 = vmatpush1.bf16.msra.mxu0 %v391_v28 }
  0x5d   :  { %272 = vmatprep.subr.bf16.mxu0 %v392_v29 }
  0x60   :  { %273 = vmatpush1.bf16.msra.mxu0 %v394_v30 }
  0x61   :  { %274 = vmatprep.subr.bf16.mxu0 %v395_v31 }
  0x64   :  { %275 = vmatpush1.bf16.msra.mxu0 %v397_v32 }
  0x67   :  { %277 = vmatmul.mubr.bf16.vlgmr.msra.gmra.mrb[0].mxu0 %v398_v33 }
 0x13a   :  { %v278_v34 = vpop.f32.mrb[0].mxu0 }
 0x13b   :  { %287 = vst [vmem:[#allocation7] sm:$0xff] %v278_v34  ;;  %v280_v35 = vpop.f32.mrb[1].mxu0 }
 0x13c   :  { %288 = vst [vmem:[#allocation7 + $0x8] sm:$0xff] %v280_v35  ;;  %v282_v36 = vpop.f32.mrb[2].mxu0 }
 0x13d   :  { %289 = vst [vmem:[#allocation7 + $0x10] sm:$0xff] %v282_v36  ;;  %v284_v37 = vpop.f32.mrb[3].mxu0 }
 0x13e   :  { %290 = vst [vmem:[#allocation7 + $0x18] sm:$0xff] %v284_v37 }
 0x13f   :  { %456 = shalt.err (!%p453_p6)
}
 0x140   :  { %s457_s10 = scalar_lea.hbm %s533_s2, 512 }
 0x141   :  { %p458_p7 = scmp.ne.s32.totalorder %s533_s2, %s457_s10  ;;  %p461_p8 = scmp.lt.u32.totalorder %s457_s10, %s533_s2 }
 0x143   :  { %p463_p9 = pnand %p461_p8, %p458_p7 }
 0x145   :  { %466 = shalt.err (!%p463_p9)
}
 0x146   :  { %s478_s15 = smov 256   ;;  %s479_s16 = smov 16  }
 0x147   :  { %302 = dma.vmem_to_hbm [thread:$0]  %s297_s6, 512, %s533_s2, [#allocation4], %s478_s15, %s478_s15, %s479_s16  }
 0x148   :  { %471 = dma.done.wait [#allocation4], 512  }
 0x149   :  { %472 = vsyncadd [#allocation4], 4294966784 }
 0x14a   :  { %306 = vsyncpa [#allocation3], 1 }
 0x14b   :  { %307 = vsyncpa [#allocation6], 1 }
 0x14c   :  { %308 = vsyncpa [#allocation4], 1 }

</bundles_post_ra>
